<compile_context>
chip_gen: v7x
topology: tpu7x:2x2x1
jax: 0.10.0
libtpu: 0.0.40
codegen_flags: <defaults>
</compile_context>

<pallas_src>
import functools

import jax
import jax.numpy as jnp
import numpy as np
from jax import lax
from jax.experimental import pallas as pl
from jax.experimental.pallas import tpu as pltpu


def lstm_reg_kernel(x_ref, wih_ref, whh_ref, b_ref, w1_ref, b1_ref, w2_ref, b2_ref,
                    out_ref, hn_ref, cn_ref, *, n_time, n_batch):
    """Single-invocation kernel: sequential LSTM over T + post-loop regressor head.

    x_ref   : (T*N, D)    time-major, flattened (row t*N + n)
    wih_ref : (D, 4H)     transposed weight_ih, gate order (f, i, o, g), g cols x2
    whh_ref : (H, 4H)     transposed weight_hh, same gate order / scaling
    b_ref   : (1, 4H)     b_ih + b_hh, same gate order / scaling
    w1_ref  : (T*H, T*H)  block-diagonal kron(I_T, regressor W1^T)
    b1_ref  : (1, T*H)    regressor b1 tiled T times
    w2_ref  : (T*H, T)    block-diagonal kron(I_T, regressor W2^T)
    b2_ref  : (1, T)      regressor b2 broadcast over the T columns
    out_ref : (N, T)      per-(batch, time) scalar predictions; single store
    hn_ref  : (N, H)      final hidden state
    cn_ref  : (N, H)      final cell state
    """
    T, N = n_time, n_batch
    H = hn_ref.shape[1]

    # Input projection for all timesteps in one MXU matmul (bias fused in);
    # only h @ W_hh remains on the serial recurrence critical path.
    xw = (jnp.dot(x_ref[...], wih_ref[...], preferred_element_type=jnp.float32)
          + b_ref[...])                                      # (T*N, 4H)

    # Hoist loop-invariant recurrent weight out of the loop.
    whh = whh_ref[...]                                       # (H, 4H)

    # h_state=None -> zero initial states; carried as values (vregs), not VMEM.
    h = jnp.zeros((N, H), jnp.float32)
    c = jnp.zeros((N, H), jnp.float32)
    h_steps = []                                             # per-step h, in vregs

    # Fully unrolled time loop: T is static and tiny, all slices are static.
    for t in range(T):
        row = t * N
        gates = xw[row:row + N, :] + jnp.dot(h, whh,
                                             preferred_element_type=jnp.float32)
        # Gate order (f, i, o, g), g pre-activation pre-scaled by 2 in the
        # wrapper: ONE sigmoid over the full (N, 4H) vreg, then
        # tanh(a) = 2*sigmoid(2a) - 1 recovered with VPU-only work.
        s = jax.nn.sigmoid(gates)
        f_g = s[:, 0 * H:1 * H]          # lanes 0:H -> aligned with c, no rotate
        i_g = s[:, 1 * H:2 * H]
        o_g = s[:, 2 * H:3 * H]
        g_g = 2.0 * s[:, 3 * H:4 * H] - 1.0

        c = f_g * c + i_g * g_g
        h = o_g * jnp.tanh(c)
        h_steps.append(h)                # stays in registers; no VMEM round trip

    hn_ref[...] = h
    cn_ref[...] = c

    # Regressor head: Linear(H,H) -> LeakyReLU(0.02) -> Dropout(identity)
    # -> Linear(H,1), applied to ALL T*N hidden states with two MXU matmuls on
    # a lane-dense (N, T*H) slab using block-diagonal weights.  Output is a
    # single lane-dense (N, T) store (no (T*N,1) lane-1 masked stores).
    h_cat = jnp.concatenate(h_steps, axis=1)                 # (N, T*H)
    h1 = (jnp.dot(h_cat, w1_ref[...], preferred_element_type=jnp.float32)
          + b1_ref[...])                                     # (N, T*H)
    h1 = jnp.where(h1 > 0, h1, 0.02 * h1)                    # LeakyReLU(0.02)
    # TODO(synk): dropout is inference-mode identity here.
    y = (jnp.dot(h1, w2_ref[...], preferred_element_type=jnp.float32)
         + b2_ref[...])                                      # (N, T)
    out_ref[...] = y                                         # single store


def _prep_gate_mat(w, H):
    """PyTorch LSTM gate blocks (i, f, g, o) -> kernel order (f, i, o, g) along
    axis 0, with the g block pre-scaled by 2 (for the tanh-via-sigmoid fusion)."""
    i, f, g, o = w[0:H], w[1 * H:2 * H], w[2 * H:3 * H], w[3 * H:4 * H]
    return jnp.concatenate([f, i, o, 2.0 * g], axis=0)


@jax.jit
def rnn_arch_forward(x, params):
    """x: (N, T, D) float32.  Returns (out (N, T), (h_n (1,N,H), c_n (1,N,H)))."""
    N, T, D = x.shape
    H = params["w_hh"].shape[1]

    # (N, T, D) -> time-major, flattened to (T*N, D): row t*N + n.
    x_flat = jnp.transpose(x, (1, 0, 2)).reshape(T * N, D)

    # Gate-reordered / g-scaled / transposed weights (wrapper-side, free under jit).
    wih_t = _prep_gate_mat(params["w_ih"], H).T              # (D, 4H)
    whh_t = _prep_gate_mat(params["w_hh"], H).T              # (H, 4H)
    b = _prep_gate_mat((params["b_ih"] + params["b_hh"])[:, None], H).T   # (1, 4H)

    # Block-diagonal head weights: apply the same (H,H)/(H,1) Linear to every
    # timestep of the lane-dense (N, T*H) hidden slab with one MXU matmul each.
    eye_t = jnp.eye(T, dtype=jnp.float32)
    w1_blk = jnp.kron(eye_t, params["w1"].T)                 # (T*H, T*H)
    b1_cat = jnp.tile(params["b1"], T)[None, :]              # (1, T*H)
    w2_blk = jnp.kron(eye_t, params["w2"].T)                 # (T*H, T)
    b2_row = jnp.tile(params["b2"].reshape(1, 1), (1, T))    # (1, T)

    vmem = pl.BlockSpec(memory_space=pltpu.MemorySpace.VMEM)

    out, hn, cn = pl.pallas_call(
        functools.partial(lstm_reg_kernel, n_time=T, n_batch=N),
        out_shape=(
            jax.ShapeDtypeStruct((N, T), jnp.float32),
            jax.ShapeDtypeStruct((N, H), jnp.float32),
            jax.ShapeDtypeStruct((N, H), jnp.float32),
        ),
        in_specs=[vmem] * 8,
        out_specs=(vmem, vmem, vmem),
    )(x_flat, wih_t, whh_t, b, w1_blk, b1_cat, w2_blk, b2_row)

    return out, (hn[None], cn[None])


def make_params(key, input_size, hidden_size):
    """Deterministic parameter init mirroring the PyTorch shapes (gate order i,f,g,o)."""
    D, H = input_size, hidden_size
    k_rnn = 1.0 / np.sqrt(H)
    keys = jax.random.split(key, 8)
    u = lambda kk, shape, bound: jax.random.uniform(
        kk, shape, jnp.float32, minval=-bound, maxval=bound)
    return {
        "w_ih": u(keys[0], (4 * H, D), k_rnn),   # nn.LSTM weight_ih_l0
        "w_hh": u(keys[1], (4 * H, H), k_rnn),   # nn.LSTM weight_hh_l0
        "b_ih": u(keys[2], (4 * H,), k_rnn),
        "b_hh": u(keys[3], (4 * H,), k_rnn),
        "w1": u(keys[4], (H, H), 1.0 / np.sqrt(H)),   # regressor Linear(H, H)
        "b1": u(keys[5], (H,), 1.0 / np.sqrt(H)),
        "w2": u(keys[6], (1, H), 1.0 / np.sqrt(H)),   # regressor Linear(H, 1)
        "b2": u(keys[7], (1,), 1.0 / np.sqrt(H)),
    }


def ref_forward(x, params):
    """Pure-JAX reference (mirrors PyTorch nn.LSTM + regressor, inference mode)."""
    N, T, D = x.shape
    H = params["w_hh"].shape[1]
    x_tm = jnp.transpose(x, (1, 0, 2))

    def cell(carry, x_t):
        h, c = carry
        gates = (x_t @ params["w_ih"].T + params["b_ih"]
                 + h @ params["w_hh"].T + params["b_hh"])
        i_g = jax.nn.sigmoid(gates[:, 0 * H:1 * H])
        f_g = jax.nn.sigmoid(gates[:, 1 * H:2 * H])
        g_g = jnp.tanh(gates[:, 2 * H:3 * H])
        o_g = jax.nn.sigmoid(gates[:, 3 * H:4 * H])
        c_new = f_g * c + i_g * g_g
        h_new = o_g * jnp.tanh(c_new)
        return (h_new, c_new), h_new

    h0 = jnp.zeros((N, H), jnp.float32)
    (hn, cn), out_rnn = lax.scan(cell, (h0, h0), x_tm)
    out_rnn = jnp.transpose(out_rnn, (1, 0, 2))              # (N, T, H)

    h1 = out_rnn @ params["w1"].T + params["b1"]
    h1 = jnp.where(h1 > 0, h1, 0.02 * h1)
    out = h1 @ params["w2"].T + params["b2"]                 # (N, T, 1)
    return out[..., 0], (hn[None], cn[None])


if __name__ == "__main__":
    N, T, D, H = 8, 8, 16, 32   # batch, seq, input_size, hidden_size

    key = jax.random.PRNGKey(0)
    kx, kp = jax.random.split(key)
    x = jax.random.normal(kx, (N, T, D), dtype=jnp.float32)
    params = make_params(kp, D, H)

    out, (hn, cn) = rnn_arch_forward(x, params)
    jax.block_until_ready((out, hn, cn))

    out_ref, (hn_ref, cn_ref) = ref_forward(x, params)
    np.testing.assert_allclose(np.asarray(out), np.asarray(out_ref), rtol=2e-3, atol=2e-3)
    np.testing.assert_allclose(np.asarray(hn), np.asarray(hn_ref), rtol=2e-3, atol=2e-3)
    np.testing.assert_allclose(np.asarray(cn), np.asarray(cn_ref), rtol=2e-3, atol=2e-3)

    print("KERNEL_OK")
</pallas_src>

<mosaic_0001>
module attributes {stable_mosaic.version = 11 : i64} {
  func.func @lstm_reg_kernel(%arg0: memref<64x16xf32, #tpu.memory_space<vmem>>, %arg1: memref<16x128xf32, #tpu.memory_space<vmem>>, %arg2: memref<32x128xf32, #tpu.memory_space<vmem>>, %arg3: memref<1x128xf32, #tpu.memory_space<vmem>>, %arg4: memref<256x256xf32, #tpu.memory_space<vmem>>, %arg5: memref<1x256xf32, #tpu.memory_space<vmem>>, %arg6: memref<256x8xf32, #tpu.memory_space<vmem>>, %arg7: memref<1x8xf32, #tpu.memory_space<vmem>>, %arg8: memref<8x8xf32, #tpu.memory_space<vmem>>, %arg9: memref<8x32xf32, #tpu.memory_space<vmem>>, %arg10: memref<8x32xf32, #tpu.memory_space<vmem>>) attributes {dimension_semantics = [], scalar_prefetch = 0 : i64, scratch_operands = 0 : i64, tpu.core_type = #tpu.core_type<tc>} {
    %c0 = arith.constant 0 : index
    %c0_0 = arith.constant 0 : index
    %0 = vector.load %arg0[%c0, %c0_0] : memref<64x16xf32, #tpu.memory_space<vmem>>, vector<64x16xf32>
    %c0_1 = arith.constant 0 : index
    %c0_2 = arith.constant 0 : index
    %1 = vector.load %arg1[%c0_1, %c0_2] : memref<16x128xf32, #tpu.memory_space<vmem>>, vector<16x128xf32>
    %cst = arith.constant dense<0.000000e+00> : vector<64x128xf32>
    %2 = tpu.matmul %0, %1, %cst {dimension_numbers = #tpu.dot_dimension_numbers<[1], [0], [0], [1], [0, 0, 1, 1], [], []>} : vector<64x16xf32>, vector<16x128xf32>, vector<64x128xf32> -> vector<64x128xf32>
    %c0_3 = arith.constant 0 : index
    %c0_4 = arith.constant 0 : index
    %3 = vector.load %arg3[%c0_3, %c0_4] : memref<1x128xf32, #tpu.memory_space<vmem>>, vector<1x128xf32>
    %4 = vector.broadcast %3 : vector<1x128xf32> to vector<64x128xf32>
    %5 = arith.addf %2, %4 : vector<64x128xf32>
    %c0_5 = arith.constant 0 : index
    %c0_6 = arith.constant 0 : index
    %6 = vector.load %arg2[%c0_5, %c0_6] : memref<32x128xf32, #tpu.memory_space<vmem>>, vector<32x128xf32>
    %cst_7 = arith.constant 0.000000e+00 : f32
    %7 = vector.broadcast %cst_7 : f32 to vector<8x32xf32>
    %cst_8 = arith.constant 0.000000e+00 : f32
    %8 = vector.broadcast %cst_8 : f32 to vector<8x32xf32>
    %9 = vector.extract_strided_slice %5 {offsets = [0, 0], sizes = [8, 128], strides = [1, 1]} : vector<64x128xf32> to vector<8x128xf32>
    %cst_9 = arith.constant dense<0.000000e+00> : vector<8x128xf32>
    %10 = tpu.matmul %7, %6, %cst_9 {dimension_numbers = #tpu.dot_dimension_numbers<[1], [0], [0], [1], [0, 0, 1, 1], [], []>} : vector<8x32xf32>, vector<32x128xf32>, vector<8x128xf32> -> vector<8x128xf32>
    %11 = arith.addf %9, %10 : vector<8x128xf32>
    %12 = arith.negf %11 : vector<8x128xf32>
    %13 = math.exp %12 : vector<8x128xf32>
    %cst_10 = arith.constant 1.000000e+00 : f32
    %14 = vector.broadcast %cst_10 : f32 to vector<8x128xf32>
    %15 = arith.addf %14, %13 : vector<8x128xf32>
    %16 = arith.divf %14, %15 : vector<8x128xf32>
    %17 = vector.extract_strided_slice %16 {offsets = [0, 0], sizes = [8, 32], strides = [1, 1]} : vector<8x128xf32> to vector<8x32xf32>
    %18 = vector.extract_strided_slice %16 {offsets = [0, 32], sizes = [8, 32], strides = [1, 1]} : vector<8x128xf32> to vector<8x32xf32>
    %19 = vector.extract_strided_slice %16 {offsets = [0, 64], sizes = [8, 32], strides = [1, 1]} : vector<8x128xf32> to vector<8x32xf32>
    %20 = vector.extract_strided_slice %16 {offsets = [0, 96], sizes = [8, 32], strides = [1, 1]} : vector<8x128xf32> to vector<8x32xf32>
    %cst_11 = arith.constant 2.000000e+00 : f32
    %21 = vector.broadcast %cst_11 : f32 to vector<8x32xf32>
    %22 = arith.mulf %21, %20 : vector<8x32xf32>
    %cst_12 = arith.constant 1.000000e+00 : f32
    %23 = vector.broadcast %cst_12 : f32 to vector<8x32xf32>
    %24 = arith.subf %22, %23 : vector<8x32xf32>
    %25 = arith.mulf %17, %8 : vector<8x32xf32>
    %26 = arith.mulf %18, %24 : vector<8x32xf32>
    %27 = arith.addf %25, %26 : vector<8x32xf32>
    %28 = math.tanh %27 : vector<8x32xf32>
    %29 = arith.mulf %19, %28 : vector<8x32xf32>
    %30 = vector.extract_strided_slice %5 {offsets = [8, 0], sizes = [8, 128], strides = [1, 1]} : vector<64x128xf32> to vector<8x128xf32>
    %cst_13 = arith.constant dense<0.000000e+00> : vector<8x128xf32>
    %31 = tpu.matmul %29, %6, %cst_13 {dimension_numbers = #tpu.dot_dimension_numbers<[1], [0], [0], [1], [0, 0, 1, 1], [], []>} : vector<8x32xf32>, vector<32x128xf32>, vector<8x128xf32> -> vector<8x128xf32>
    %32 = arith.addf %30, %31 : vector<8x128xf32>
    %33 = arith.negf %32 : vector<8x128xf32>
    %34 = math.exp %33 : vector<8x128xf32>
    %cst_14 = arith.constant 1.000000e+00 : f32
    %35 = vector.broadcast %cst_14 : f32 to vector<8x128xf32>
    %36 = arith.addf %35, %34 : vector<8x128xf32>
    %37 = arith.divf %35, %36 : vector<8x128xf32>
    %38 = vector.extract_strided_slice %37 {offsets = [0, 0], sizes = [8, 32], strides = [1, 1]} : vector<8x128xf32> to vector<8x32xf32>
    %39 = vector.extract_strided_slice %37 {offsets = [0, 32], sizes = [8, 32], strides = [1, 1]} : vector<8x128xf32> to vector<8x32xf32>
    %40 = vector.extract_strided_slice %37 {offsets = [0, 64], sizes = [8, 32], strides = [1, 1]} : vector<8x128xf32> to vector<8x32xf32>
    %41 = vector.extract_strided_slice %37 {offsets = [0, 96], sizes = [8, 32], strides = [1, 1]} : vector<8x128xf32> to vector<8x32xf32>
    %cst_15 = arith.constant 2.000000e+00 : f32
    %42 = vector.broadcast %cst_15 : f32 to vector<8x32xf32>
    %43 = arith.mulf %42, %41 : vector<8x32xf32>
    %cst_16 = arith.constant 1.000000e+00 : f32
    %44 = vector.broadcast %cst_16 : f32 to vector<8x32xf32>
    %45 = arith.subf %43, %44 : vector<8x32xf32>
    %46 = arith.mulf %38, %27 : vector<8x32xf32>
    %47 = arith.mulf %39, %45 : vector<8x32xf32>
    %48 = arith.addf %46, %47 : vector<8x32xf32>
    %49 = math.tanh %48 : vector<8x32xf32>
    %50 = arith.mulf %40, %49 : vector<8x32xf32>
    %51 = vector.extract_strided_slice %5 {offsets = [16, 0], sizes = [8, 128], strides = [1, 1]} : vector<64x128xf32> to vector<8x128xf32>
    %cst_17 = arith.constant dense<0.000000e+00> : vector<8x128xf32>
    %52 = tpu.matmul %50, %6, %cst_17 {dimension_numbers = #tpu.dot_dimension_numbers<[1], [0], [0], [1], [0, 0, 1, 1], [], []>} : vector<8x32xf32>, vector<32x128xf32>, vector<8x128xf32> -> vector<8x128xf32>
    %53 = arith.addf %51, %52 : vector<8x128xf32>
    %54 = arith.negf %53 : vector<8x128xf32>
    %55 = math.exp %54 : vector<8x128xf32>
    %cst_18 = arith.constant 1.000000e+00 : f32
    %56 = vector.broadcast %cst_18 : f32 to vector<8x128xf32>
    %57 = arith.addf %56, %55 : vector<8x128xf32>
    %58 = arith.divf %56, %57 : vector<8x128xf32>
    %59 = vector.extract_strided_slice %58 {offsets = [0, 0], sizes = [8, 32], strides = [1, 1]} : vector<8x128xf32> to vector<8x32xf32>
    %60 = vector.extract_strided_slice %58 {offsets = [0, 32], sizes = [8, 32], strides = [1, 1]} : vector<8x128xf32> to vector<8x32xf32>
    %61 = vector.extract_strided_slice %58 {offsets = [0, 64], sizes = [8, 32], strides = [1, 1]} : vector<8x128xf32> to vector<8x32xf32>
    %62 = vector.extract_strided_slice %58 {offsets = [0, 96], sizes = [8, 32], strides = [1, 1]} : vector<8x128xf32> to vector<8x32xf32>
    %cst_19 = arith.constant 2.000000e+00 : f32
    %63 = vector.broadcast %cst_19 : f32 to vector<8x32xf32>
    %64 = arith.mulf %63, %62 : vector<8x32xf32>
    %cst_20 = arith.constant 1.000000e+00 : f32
    %65 = vector.broadcast %cst_20 : f32 to vector<8x32xf32>
    %66 = arith.subf %64, %65 : vector<8x32xf32>
    %67 = arith.mulf %59, %48 : vector<8x32xf32>
    %68 = arith.mulf %60, %66 : vector<8x32xf32>
    %69 = arith.addf %67, %68 : vector<8x32xf32>
    %70 = math.tanh %69 : vector<8x32xf32>
    %71 = arith.mulf %61, %70 : vector<8x32xf32>
    %72 = vector.extract_strided_slice %5 {offsets = [24, 0], sizes = [8, 128], strides = [1, 1]} : vector<64x128xf32> to vector<8x128xf32>
    %cst_21 = arith.constant dense<0.000000e+00> : vector<8x128xf32>
    %73 = tpu.matmul %71, %6, %cst_21 {dimension_numbers = #tpu.dot_dimension_numbers<[1], [0], [0], [1], [0, 0, 1, 1], [], []>} : vector<8x32xf32>, vector<32x128xf32>, vector<8x128xf32> -> vector<8x128xf32>
    %74 = arith.addf %72, %73 : vector<8x128xf32>
    %75 = arith.negf %74 : vector<8x128xf32>
    %76 = math.exp %75 : vector<8x128xf32>
    %cst_22 = arith.constant 1.000000e+00 : f32
    %77 = vector.broadcast %cst_22 : f32 to vector<8x128xf32>
    %78 = arith.addf %77, %76 : vector<8x128xf32>
    %79 = arith.divf %77, %78 : vector<8x128xf32>
    %80 = vector.extract_strided_slice %79 {offsets = [0, 0], sizes = [8, 32], strides = [1, 1]} : vector<8x128xf32> to vector<8x32xf32>
    %81 = vector.extract_strided_slice %79 {offsets = [0, 32], sizes = [8, 32], strides = [1, 1]} : vector<8x128xf32> to vector<8x32xf32>
    %82 = vector.extract_strided_slice %79 {offsets = [0, 64], sizes = [8, 32], strides = [1, 1]} : vector<8x128xf32> to vector<8x32xf32>
    %83 = vector.extract_strided_slice %79 {offsets = [0, 96], sizes = [8, 32], strides = [1, 1]} : vector<8x128xf32> to vector<8x32xf32>
    %cst_23 = arith.constant 2.000000e+00 : f32
    %84 = vector.broadcast %cst_23 : f32 to vector<8x32xf32>
    %85 = arith.mulf %84, %83 : vector<8x32xf32>
    %cst_24 = arith.constant 1.000000e+00 : f32
    %86 = vector.broadcast %cst_24 : f32 to vector<8x32xf32>
    %87 = arith.subf %85, %86 : vector<8x32xf32>
    %88 = arith.mulf %80, %69 : vector<8x32xf32>
    %89 = arith.mulf %81, %87 : vector<8x32xf32>
    %90 = arith.addf %88, %89 : vector<8x32xf32>
    %91 = math.tanh %90 : vector<8x32xf32>
    %92 = arith.mulf %82, %91 : vector<8x32xf32>
    %93 = vector.extract_strided_slice %5 {offsets = [32, 0], sizes = [8, 128], strides = [1, 1]} : vector<64x128xf32> to vector<8x128xf32>
    %cst_25 = arith.constant dense<0.000000e+00> : vector<8x128xf32>
    %94 = tpu.matmul %92, %6, %cst_25 {dimension_numbers = #tpu.dot_dimension_numbers<[1], [0], [0], [1], [0, 0, 1, 1], [], []>} : vector<8x32xf32>, vector<32x128xf32>, vector<8x128xf32> -> vector<8x128xf32>
    %95 = arith.addf %93, %94 : vector<8x128xf32>
    %96 = arith.negf %95 : vector<8x128xf32>
    %97 = math.exp %96 : vector<8x128xf32>
    %cst_26 = arith.constant 1.000000e+00 : f32
    %98 = vector.broadcast %cst_26 : f32 to vector<8x128xf32>
    %99 = arith.addf %98, %97 : vector<8x128xf32>
    %100 = arith.divf %98, %99 : vector<8x128xf32>
    %101 = vector.extract_strided_slice %100 {offsets = [0, 0], sizes = [8, 32], strides = [1, 1]} : vector<8x128xf32> to vector<8x32xf32>
    %102 = vector.extract_strided_slice %100 {offsets = [0, 32], sizes = [8, 32], strides = [1, 1]} : vector<8x128xf32> to vector<8x32xf32>
    %103 = vector.extract_strided_slice %100 {offsets = [0, 64], sizes = [8, 32], strides = [1, 1]} : vector<8x128xf32> to vector<8x32xf32>
    %104 = vector.extract_strided_slice %100 {offsets = [0, 96], sizes = [8, 32], strides = [1, 1]} : vector<8x128xf32> to vector<8x32xf32>
    %cst_27 = arith.constant 2.000000e+00 : f32
    %105 = vector.broadcast %cst_27 : f32 to vector<8x32xf32>
    %106 = arith.mulf %105, %104 : vector<8x32xf32>
    %cst_28 = arith.constant 1.000000e+00 : f32
    %107 = vector.broadcast %cst_28 : f32 to vector<8x32xf32>
    %108 = arith.subf %106, %107 : vector<8x32xf32>
    %109 = arith.mulf %101, %90 : vector<8x32xf32>
    %110 = arith.mulf %102, %108 : vector<8x32xf32>
    %111 = arith.addf %109, %110 : vector<8x32xf32>
    %112 = math.tanh %111 : vector<8x32xf32>
    %113 = arith.mulf %103, %112 : vector<8x32xf32>
    %114 = vector.extract_strided_slice %5 {offsets = [40, 0], sizes = [8, 128], strides = [1, 1]} : vector<64x128xf32> to vector<8x128xf32>
    %cst_29 = arith.constant dense<0.000000e+00> : vector<8x128xf32>
    %115 = tpu.matmul %113, %6, %cst_29 {dimension_numbers = #tpu.dot_dimension_numbers<[1], [0], [0], [1], [0, 0, 1, 1], [], []>} : vector<8x32xf32>, vector<32x128xf32>, vector<8x128xf32> -> vector<8x128xf32>
    %116 = arith.addf %114, %115 : vector<8x128xf32>
    %117 = arith.negf %116 : vector<8x128xf32>
    %118 = math.exp %117 : vector<8x128xf32>
    %cst_30 = arith.constant 1.000000e+00 : f32
    %119 = vector.broadcast %cst_30 : f32 to vector<8x128xf32>
    %120 = arith.addf %119, %118 : vector<8x128xf32>
    %121 = arith.divf %119, %120 : vector<8x128xf32>
    %122 = vector.extract_strided_slice %121 {offsets = [0, 0], sizes = [8, 32], strides = [1, 1]} : vector<8x128xf32> to vector<8x32xf32>
    %123 = vector.extract_strided_slice %121 {offsets = [0, 32], sizes = [8, 32], strides = [1, 1]} : vector<8x128xf32> to vector<8x32xf32>
    %124 = vector.extract_strided_slice %121 {offsets = [0, 64], sizes = [8, 32], strides = [1, 1]} : vector<8x128xf32> to vector<8x32xf32>
    %125 = vector.extract_strided_slice %121 {offsets = [0, 96], sizes = [8, 32], strides = [1, 1]} : vector<8x128xf32> to vector<8x32xf32>
    %cst_31 = arith.constant 2.000000e+00 : f32
    %126 = vector.broadcast %cst_31 : f32 to vector<8x32xf32>
    %127 = arith.mulf %126, %125 : vector<8x32xf32>
    %cst_32 = arith.constant 1.000000e+00 : f32
    %128 = vector.broadcast %cst_32 : f32 to vector<8x32xf32>
    %129 = arith.subf %127, %128 : vector<8x32xf32>
    %130 = arith.mulf %122, %111 : vector<8x32xf32>
    %131 = arith.mulf %123, %129 : vector<8x32xf32>
    %132 = arith.addf %130, %131 : vector<8x32xf32>
    %133 = math.tanh %132 : vector<8x32xf32>
    %134 = arith.mulf %124, %133 : vector<8x32xf32>
    %135 = vector.extract_strided_slice %5 {offsets = [48, 0], sizes = [8, 128], strides = [1, 1]} : vector<64x128xf32> to vector<8x128xf32>
    %cst_33 = arith.constant dense<0.000000e+00> : vector<8x128xf32>
    %136 = tpu.matmul %134, %6, %cst_33 {dimension_numbers = #tpu.dot_dimension_numbers<[1], [0], [0], [1], [0, 0, 1, 1], [], []>} : vector<8x32xf32>, vector<32x128xf32>, vector<8x128xf32> -> vector<8x128xf32>
    %137 = arith.addf %135, %136 : vector<8x128xf32>
    %138 = arith.negf %137 : vector<8x128xf32>
    %139 = math.exp %138 : vector<8x128xf32>
    %cst_34 = arith.constant 1.000000e+00 : f32
    %140 = vector.broadcast %cst_34 : f32 to vector<8x128xf32>
    %141 = arith.addf %140, %139 : vector<8x128xf32>
    %142 = arith.divf %140, %141 : vector<8x128xf32>
    %143 = vector.extract_strided_slice %142 {offsets = [0, 0], sizes = [8, 32], strides = [1, 1]} : vector<8x128xf32> to vector<8x32xf32>
    %144 = vector.extract_strided_slice %142 {offsets = [0, 32], sizes = [8, 32], strides = [1, 1]} : vector<8x128xf32> to vector<8x32xf32>
    %145 = vector.extract_strided_slice %142 {offsets = [0, 64], sizes = [8, 32], strides = [1, 1]} : vector<8x128xf32> to vector<8x32xf32>
    %146 = vector.extract_strided_slice %142 {offsets = [0, 96], sizes = [8, 32], strides = [1, 1]} : vector<8x128xf32> to vector<8x32xf32>
    %cst_35 = arith.constant 2.000000e+00 : f32
    %147 = vector.broadcast %cst_35 : f32 to vector<8x32xf32>
    %148 = arith.mulf %147, %146 : vector<8x32xf32>
    %cst_36 = arith.constant 1.000000e+00 : f32
    %149 = vector.broadcast %cst_36 : f32 to vector<8x32xf32>
    %150 = arith.subf %148, %149 : vector<8x32xf32>
    %151 = arith.mulf %143, %132 : vector<8x32xf32>
    %152 = arith.mulf %144, %150 : vector<8x32xf32>
    %153 = arith.addf %151, %152 : vector<8x32xf32>
    %154 = math.tanh %153 : vector<8x32xf32>
    %155 = arith.mulf %145, %154 : vector<8x32xf32>
    %156 = vector.extract_strided_slice %5 {offsets = [56, 0], sizes = [8, 128], strides = [1, 1]} : vector<64x128xf32> to vector<8x128xf32>
    %cst_37 = arith.constant dense<0.000000e+00> : vector<8x128xf32>
    %157 = tpu.matmul %155, %6, %cst_37 {dimension_numbers = #tpu.dot_dimension_numbers<[1], [0], [0], [1], [0, 0, 1, 1], [], []>} : vector<8x32xf32>, vector<32x128xf32>, vector<8x128xf32> -> vector<8x128xf32>
    %158 = arith.addf %156, %157 : vector<8x128xf32>
    %159 = arith.negf %158 : vector<8x128xf32>
    %160 = math.exp %159 : vector<8x128xf32>
    %cst_38 = arith.constant 1.000000e+00 : f32
    %161 = vector.broadcast %cst_38 : f32 to vector<8x128xf32>
    %162 = arith.addf %161, %160 : vector<8x128xf32>
    %163 = arith.divf %161, %162 : vector<8x128xf32>
    %164 = vector.extract_strided_slice %163 {offsets = [0, 0], sizes = [8, 32], strides = [1, 1]} : vector<8x128xf32> to vector<8x32xf32>
    %165 = vector.extract_strided_slice %163 {offsets = [0, 32], sizes = [8, 32], strides = [1, 1]} : vector<8x128xf32> to vector<8x32xf32>
    %166 = vector.extract_strided_slice %163 {offsets = [0, 64], sizes = [8, 32], strides = [1, 1]} : vector<8x128xf32> to vector<8x32xf32>
    %167 = vector.extract_strided_slice %163 {offsets = [0, 96], sizes = [8, 32], strides = [1, 1]} : vector<8x128xf32> to vector<8x32xf32>
    %cst_39 = arith.constant 2.000000e+00 : f32
    %168 = vector.broadcast %cst_39 : f32 to vector<8x32xf32>
    %169 = arith.mulf %168, %167 : vector<8x32xf32>
    %cst_40 = arith.constant 1.000000e+00 : f32
    %170 = vector.broadcast %cst_40 : f32 to vector<8x32xf32>
    %171 = arith.subf %169, %170 : vector<8x32xf32>
    %172 = arith.mulf %164, %153 : vector<8x32xf32>
    %173 = arith.mulf %165, %171 : vector<8x32xf32>
    %174 = arith.addf %172, %173 : vector<8x32xf32>
    %175 = math.tanh %174 : vector<8x32xf32>
    %176 = arith.mulf %166, %175 : vector<8x32xf32>
    %c0_41 = arith.constant 0 : index
    %c0_42 = arith.constant 0 : index
    %177 = vector.load %arg9[%c0_41, %c0_42] : memref<8x32xf32, #tpu.memory_space<vmem>>, vector<8x32xf32>
    tpu.vector_store %arg9[%c0_41, %c0_42], %176 {strides = array<i32>} : memref<8x32xf32, #tpu.memory_space<vmem>>, vector<8x32xf32>,
    %c0_43 = arith.constant 0 : index
    %c0_44 = arith.constant 0 : index
    %178 = vector.load %arg10[%c0_43, %c0_44] : memref<8x32xf32, #tpu.memory_space<vmem>>, vector<8x32xf32>
    tpu.vector_store %arg10[%c0_43, %c0_44], %174 {strides = array<i32>} : memref<8x32xf32, #tpu.memory_space<vmem>>, vector<8x32xf32>,
    %179 = tpu.concatenate %29, %50, %71, %92, %113, %134, %155, %176 in 1 : vector<8x32xf32>, vector<8x32xf32>, vector<8x32xf32>, vector<8x32xf32>, vector<8x32xf32>, vector<8x32xf32>, vector<8x32xf32>, vector<8x32xf32> -> vector<8x256xf32>
    %c0_45 = arith.constant 0 : index
    %c0_46 = arith.constant 0 : index
    %180 = vector.load %arg4[%c0_45, %c0_46] : memref<256x256xf32, #tpu.memory_space<vmem>>, vector<256x256xf32>
    %cst_47 = arith.constant dense<0.000000e+00> : vector<8x256xf32>
    %181 = tpu.matmul %179, %180, %cst_47 {dimension_numbers = #tpu.dot_dimension_numbers<[1], [0], [0], [1], [0, 0, 1, 1], [], []>} : vector<8x256xf32>, vector<256x256xf32>, vector<8x256xf32> -> vector<8x256xf32>
    %c0_48 = arith.constant 0 : index
    %c0_49 = arith.constant 0 : index
    %182 = vector.load %arg5[%c0_48, %c0_49] : memref<1x256xf32, #tpu.memory_space<vmem>>, vector<1x256xf32>
    %183 = vector.broadcast %182 : vector<1x256xf32> to vector<8x256xf32>
    %184 = arith.addf %181, %183 : vector<8x256xf32>
    %cst_50 = arith.constant 0.000000e+00 : f32
    %185 = vector.broadcast %cst_50 : f32 to vector<8x256xf32>
    %186 = arith.cmpf ogt, %184, %185 : vector<8x256xf32>
    %cst_51 = arith.constant 2.000000e-02 : f32
    %187 = vector.broadcast %cst_51 : f32 to vector<8x256xf32>
    %188 = arith.mulf %187, %184 : vector<8x256xf32>
    %189 = arith.select %186, %184, %188 : vector<8x256xi1>, vector<8x256xf32>
    %c0_52 = arith.constant 0 : index
    %c0_53 = arith.constant 0 : index
    %190 = vector.load %arg6[%c0_52, %c0_53] : memref<256x8xf32, #tpu.memory_space<vmem>>, vector<256x8xf32>
    %cst_54 = arith.constant dense<0.000000e+00> : vector<8x8xf32>
    %191 = tpu.matmul %189, %190, %cst_54 {dimension_numbers = #tpu.dot_dimension_numbers<[1], [0], [0], [1], [0, 0, 1, 1], [], []>} : vector<8x256xf32>, vector<256x8xf32>, vector<8x8xf32> -> vector<8x8xf32>
    %c0_55 = arith.constant 0 : index
    %c0_56 = arith.constant 0 : index
    %192 = vector.load %arg7[%c0_55, %c0_56] : memref<1x8xf32, #tpu.memory_space<vmem>>, vector<1x8xf32>
    %193 = vector.broadcast %192 : vector<1x8xf32> to vector<8x8xf32>
    %194 = arith.addf %191, %193 : vector<8x8xf32>
    %c0_57 = arith.constant 0 : index
    %c0_58 = arith.constant 0 : index
    %195 = vector.load %arg8[%c0_57, %c0_58] : memref<8x8xf32, #tpu.memory_space<vmem>>, vector<8x8xf32>
    tpu.vector_store %arg8[%c0_57, %c0_58], %194 {strides = array<i32>} : memref<8x8xf32, #tpu.memory_space<vmem>>, vector<8x8xf32>,
    return
  }
}

</mosaic_0001>

<bundles_post_ra>
// kernel: tile.13
= control target key start
LH: loop header
LB: loop body
LE: loop exit
PB: predicated region body
PF: predicated region fallthrough
CT: control target
= control target key end

     0   :  { %s7_s6 = smov 3  ;;  %s14_s9 = smov 3  ;;  %vm4_vm0 = vcmask 261120   ;;  %vm11_vm1 = vcmask 1048320   ;;  %vm18_vm2 = vcmask 785920   ;;  %vm25_vm3 = vcmask 523520   ;;  %s76_s0 = inlined_call_operand.vmem [shape: f32[8,32], index: 0, kind: input, shape index: {}]   ;;  %s77_s1 = inlined_call_operand.vmem [shape: f32[1,256], index: 1, kind: output, shape index: {}]  }
   0x1   :  { %v38_v0 = vld [vmem:[%s76_s0 + $0x3] ss:$4 sm:%s7_s6]   ;;  %s45_s10 = smov 96   ;;  %s21_s11 = smov 3  ;;  %v39_v1 = vld [vmem:[%s76_s0 + $0x2] ss:$4 sm:%s14_s9]  }
   0x2   :  { %9 = vrot.lane.b32.xlu0 %v38_v0, %s45_s10  ;;  %v40_v2 = vld [vmem:[%s76_s0 + $0x1] ss:$4 sm:%s21_s11]   ;;  %s2_s16 = smov 3  ;;  %s46_s17 = smov 32  }
   0x3   :  { %23 = vrot.lane.b32.xlu1 %v40_v2, %s46_s17  ;;  %v3_v3 = vld [vmem:[%s76_s0] ss:$4 sm:%s2_s16]   ;;  %s47_s0 = smov 64  }
   0x4   :  { %5 = vst.msk [vmem:[#allocation0] ss:$8 sm:$0x3] %vm4_vm0, %v3_v3  }
   0x6   :  { %16 = vrot.lane.b32.xlu0 %v39_v1, %s47_s0 }
  0x74   :  { %v10_v4 = vpop.permute.xlu0 %9  }
  0x75   :  { %12 = vst.msk [vmem:[#allocation0] ss:$8 sm:$0x3] %vm11_vm1, %v10_v4   ;;  %v24_v5 = vpop.permute.xlu1 %23  }
  0x78   :  { %v17_v6 = vpop.permute.xlu0 %16  }
  0x79   :  { %19 = vst.msk [vmem:[#allocation0] ss:$8 sm:$0x3] %vm18_vm2, %v17_v6  }
  0x7a   :  { %26 = vst.msk [vmem:[#allocation0] ss:$8 sm:$0x3] %vm25_vm3, %v24_v5  }
  0x81   :  { %v30_v7 = vld [vmem:[#allocation0] sm:$0x1]  ;;  %v34_v8 = vld [vmem:[#allocation0 + $0x8] sm:$0x1] }
  0x82   :  { %32 = vst [vmem:[%s77_s1] sm:$0x1] %v30_v7  ;;  %41 = vst [vmem:[%s77_s1 + $0x1] sm:$0x1] %v34_v8 }

// kernel: rnn_arch_forward.1
= control target key start
LH: loop header
LB: loop body
LE: loop exit
PB: predicated region body
PF: predicated region fallthrough
CT: control target
= control target key end

     0   :  { %16 = vsyncpa [#allocation3], 0  ;;  %vm51_vm0 = vcmask 130048   ;;  %v1832_v6 = vmov 0.0|0.0   ;;  %vm1833_vm1 = vmmov 0   ;;  %v1834_v8 = vmov 0.0   ;;  %s2424_s0 = inlined_call_operand.vmem [shape: f32[64,16], index: 0, kind: input, shape index: {}]   ;;  %s2425_s1 = inlined_call_operand.vmem [shape: f32[16,128], index: 1, kind: input, shape index: {}]   ;;  %s2426_s2 = inlined_call_operand.vmem [shape: f32[32,128], index: 2, kind: input, shape index: {}]   ;;  %s2427_s3 = inlined_call_operand.vmem [shape: f32[1,128], index: 3, kind: input, shape index: {}]   ;;  %s2428_s4 = inlined_call_operand.vmem [shape: f32[256,256], index: 4, kind: input, shape index: {}]   ;;  %s2429_s5 = inlined_call_operand.vmem [shape: f32[1,256], index: 5, kind: input, shape index: {}]   ;;  %s2430_s6 = inlined_call_operand.vmem [shape: f32[256,8], index: 6, kind: input, shape index: {}]   ;;  %s2431_s7 = inlined_call_operand.vmem [shape: f32[1,8], index: 7, kind: input, shape index: {}]   ;;  %s2432_s8 = inlined_call_operand.hbm [shape: f32[8,8], index: 8, kind: output, shape index: {0}]   ;;  %s2433_s9 = inlined_call_operand.hbm [shape: f32[8,32], index: 9, kind: output, shape index: {1}]   ;;  %s2434_s10 = inlined_call_operand.hbm [shape: f32[8,32], index: 10, kind: output, shape index: {2}]  }
   0x1   :  { %v42_v0 = vld [vmem:[%s2425_s1] sm:$0xff]  ;;  %v43_v1 = vld [vmem:[%s2425_s1 + $0x8] sm:$0xff]  ;;  %1563 = vmatprep.subr.bf16.mxu0 %v1832_v6  ;;  %1489 = vmatprep.mubr.msk.f32.mxu0 %vm1833_vm1, %v1834_v8  ;;  %v183_v10 = vld [vmem:[%s2426_s2 + $0x10] sm:$0xff] }
   0x2   :  { %v34_v2 = vld [vmem:[%s2424_s0] sm:$0xff]  ;;  %v1547_v3 = vpack.c.bf16 %v43_v1, %v42_v0  ;;  %v182_v5 = vld [vmem:[%s2426_s2 + $0x8] sm:$0xff]  ;;  %v184_v11 = vld [vmem:[%s2426_s2 + $0x18] sm:$0xff] }
   0x3   :  { %1447 = vmatprep.mubr.msk.f32.mxu1 %vm51_vm0, %v34_v2  ;;  %v181_v4 = vld [vmem:[%s2426_s2] sm:$0xff]  ;;  %v35_v9 = vld [vmem:[%s2424_s0 + $0x8] sm:$0xff] }
   0x4   :  { %v1913_v7 = vpack.c.bf16 %v182_v5, %v181_v4  ;;  %1548 = vmatprep.subr.bf16.mxu1 %v1547_v3 }
   0x5   :  { %1550 = vmatpush3.bf16.msra.mxu1 %v1547_v3 }
   0x6   :  { %1565 = vmatpush3.bf16.msra.mxu0 %v1913_v7 }
   0x7   :  { %17 = vsyncpa [#allocation5], 0  ;;  %1551 = vmatprep.subr.bf16.mxu1 %v1832_v6  ;;  %v36_v12 = vld [vmem:[%s2424_s0 + $0x10] sm:$0xff]  ;;  %1566 = vmatprep.subr.bf16.mxu0 %v1832_v6  ;;  %v1933_v13 = vpack.c.bf16 %v184_v11, %v183_v10  ;;  %v37_v14 = vld [vmem:[%s2424_s0 + $0x18] sm:$0xff]  ;;  %s1836_s20 = smov 96   ;;  %vm185_vm2 = vcmask 261120  }
   0x8   :  { %1448 = vmatmul.mubr.msk.f32.vlgmr.msra.gmra.mrb[0].mxu1 %vm51_vm0, %v35_v9  ;;  %v38_v15 = vld [vmem:[%s2424_s0 + $0x20] sm:$0xff]  ;;  %v39_v16 = vld [vmem:[%s2424_s0 + $0x28] sm:$0xff]  ;;  %v40_v17 = vld [vmem:[%s2424_s0 + $0x30] sm:$0xff]  ;;  %s1837_s16 = smov 32   ;;  %vm1013_vm3 = vcmask 523264   ;;  %vm1015_vm4 = vcmask 785408  }
   0x9   :  { %1553 = vmatpush3.bf16.msra.mxu1 %v1913_v7  ;;  %1450 = vmatprep.mubr.msk.f32.mxu1 %vm51_vm0, %v36_v12  ;;  %v41_v18 = vld [vmem:[%s2424_s0 + $0x38] sm:$0xff]  ;;  %v1325_v19 = vld [vmem:[%s2427_s3] ss:$0 sm:$0xff]  ;;  %s1835_s3 = smov 64  }
   0xa   :  { %1554 = vmatprep.subr.bf16.mxu1 %v1832_v6  ;;  %1568 = vmatpush3.bf16.msra.mxu0 %v1933_v13 }
   0xb   :  { %1575 = vmatprep.subr.bf16.mxu0 %v1832_v6 }
   0xc   :  { %1451 = vmatmul.mubr.msk.f32.gmra.mrb[2].mxu1 %vm51_vm0, %v37_v14 }
   0xd   :  { %1453 = vmatprep.mubr.msk.f32.mxu1 %vm51_vm0, %v38_v15  ;;  %1556 = vmatpush3.bf16.msra.mxu1 %v1933_v13 }
   0xe   :  { %1557 = vmatprep.subr.bf16.mxu1 %v1832_v6 }
  0x10   :  { %1454 = vmatmul.mubr.msk.f32.gmra.mrb[4].mxu1 %vm51_vm0, %v39_v16 }
  0x11   :  { %1456 = vmatprep.mubr.msk.f32.mxu1 %vm51_vm0, %v40_v17 }
  0x14   :  { %1457 = vmatmul.mubr.msk.f32.gmra.mrb[6].mxu1 %vm51_vm0, %v41_v18 }
  0x15   :  { %1467 = vmatprep.mubr.msk.f32.mxu1 %vm1833_vm1, %v1834_v8 }
  0x18   :  { %1468 = vmatmul.mubr.f32.vlgmr.msra.gmra.mrb[8].mxu1 %v1834_v8 }
  0x19   :  { %1559 = vmatpush3.bf16.msra.mxu1 %v1913_v7  ;;  %1478 = vmatprep.mubr.msk.f32.mxu1 %vm1833_vm1, %v1834_v8 }
  0x1a   :  { %1560 = vmatprep.subr.bf16.mxu1 %v1832_v6 }
  0x1d   :  { %1562 = vmatpush3.bf16.msra.mxu1 %v1933_v13 }
  0x1e   :  { %1569 = vmatprep.subr.bf16.mxu1 %v1832_v6 }
  0xdb   :  { %v1449_v20 = vpop.f32.mrb[0].mxu1 }
  0xdc   :  { %v148_v21 = vadd.f32 %v1449_v20, %v1325_v19  ;;  %v142_v22 = vpop.f32.mrb[1].mxu1 }
  0xdd   :  { %v143_v35 = vadd.f32 %v1325_v19, %v142_v22 }
  0xdf   :  { %v1452_v23 = vpop.f32.mrb[2].mxu1 }
  0xe0   :  { %v1974_v24 = vadd.f32 %v1452_v23, %v1325_v19  ;;  %v152_v25 = vpop.f32.mrb[3].mxu1 }
  0xe1   :  { %v1976_v26 = vadd.f32 %v1325_v19, %v152_v25 }
  0xe3   :  { %v1455_v27 = vpop.f32.mrb[4].mxu1 }
  0xe4   :  { %v1978_v28 = vadd.f32 %v1455_v27, %v1325_v19  ;;  %v162_v29 = vpop.f32.mrb[5].mxu1 }
  0xe5   :  { %v1980_v30 = vadd.f32 %v1325_v19, %v162_v29 }
  0xe7   :  { %v1458_v31 = vpop.f32.mrb[6].mxu1 }
  0xe8   :  { %v1982_v32 = vadd.f32 %v1458_v31, %v1325_v19  ;;  %v172_v33 = vpop.f32.mrb[7].mxu1 }
  0xe9   :  { %v1984_v34 = vadd.f32 %v1325_v19, %v172_v33 }
  0xeb   :  { %v255_v36 = vpop.f32.mrb[8].mxu1 }
  0xec   :  { %v259_v37 = vadd.f32 %v255_v36, %v143_v35  ;;  %v1469_v38 = vpop.f32.mrb[9].mxu1 }
  0xee   :  { %v1334_v39 = vmul.f32 -1.442695, %v259_v37 }
  0xf0   :  { %1714 = vpow2.f32 %v1334_v39 }
  0xfa   :  { %v1715_v40 = vpop.eup %1714 }
  0xfb   :  { %v263_v41 = vadd.f32 1.0, %v1715_v40 }
  0xfd   :  { %1716 = vrcp.f32 %v263_v41 }
 0x107   :  { %v1717_v42 = vpop.eup %1716 }
 0x108   :  { %v266_v43 = vmul.f32 2.0, %v1717_v42  ;;  %v268_v47 = vmul.f32 0.0, %v1717_v42 }
 0x10a   :  { %v1335_v44 = vadd.f32 -1.0, %v266_v43 }
 0x10c   :  { %270 = vrot.lane.b32.xlu0 %v1335_v44, %s1835_s3 }
 0x17e   :  { %v271_v45 = vpop.permute.xlu0 %270 }
 0x17f   :  { %v273_v46 = vmul.f32 %v1717_v42, %v271_v45 }
 0x181   :  { %275 = vrot.lane.b32.xlu0 %v273_v46, %s1836_s20 }
 0x1f3   :  { %v276_v48 = vpop.permute.xlu0 %275 }
 0x1f4   :  { %v278_v49 = vadd.f32 %v276_v48, %v268_v47 }
 0x1f6   :  { %1718 = vtanh.f32 %v278_v49 }
 0x200   :  { %v1719_v50 = vpop.eup %1718 }
 0x201   :  { %281 = vrot.lane.b32.xlu1 %v1719_v50, %s1835_s3 }
 0x273   :  { %v282_v51 = vpop.permute.xlu1 %281 }
 0x274   :  { %v284_v52 = vmul.f32 %v1717_v42, %v282_v51 }
 0x276   :  { %286 = vrot.lane.b32.xlu1 %v284_v52, %s1835_s3 }
 0x2e8   :  { %v1990_v53 = vpop.permute.xlu1 %286 }
 0x2e9   :  { %1479 = vmatmul.mubr.msk.f32.vlgmr.msra.gmra.mrb[10].mxu1 %vm185_vm2, %v1990_v53 }
 0x2ea   :  { %1571 = vmatpush3.bf16.msra.mxu1 %v1913_v7  ;;  %1500 = vmatprep.mubr.msk.f32.mxu1 %vm1833_vm1, %v1834_v8 }
 0x2eb   :  { %1572 = vmatprep.subr.bf16.mxu1 %v1832_v6 }
 0x2ee   :  { %1574 = vmatpush3.bf16.msra.mxu1 %v1933_v13 }
 0x2ef   :  { %1581 = vmatprep.subr.bf16.mxu1 %v1832_v6 }
 0x3bc   :  { %v356_v54 = vpop.f32.mrb[10].mxu1 }
 0x3bd   :  { %v360_v55 = vadd.f32 %v356_v54, %v148_v21  ;;  %v1480_v56 = vpop.f32.mrb[11].mxu1 }
 0x3bf   :  { %v1337_v57 = vmul.f32 -1.442695, %v360_v55 }
 0x3c1   :  { %1720 = vpow2.f32 %v1337_v57 }
 0x3cb   :  { %v1721_v58 = vpop.eup %1720 }
 0x3cc   :  { %v364_v59 = vadd.f32 1.0, %v1721_v58 }
 0x3ce   :  { %1722 = vrcp.f32 %v364_v59 }
 0x3d8   :  { %v1723_v60 = vpop.eup %1722 }
 0x3d9   :  { %v367_v61 = vmul.f32 2.0, %v1723_v60  ;;  %v369_v1 = vmul.f32 %v1723_v60, %v278_v49 }
 0x3db   :  { %v1338_v62 = vadd.f32 -1.0, %v367_v61 }
 0x3dd   :  { %371 = vrot.lane.b32.xlu0 %v1338_v62, %s1835_s3 }
 0x44f   :  { %v372_v63 = vpop.permute.xlu0 %371 }
 0x450   :  { %v374_v0 = vmul.f32 %v1723_v60, %v372_v63 }
 0x452   :  { %376 = vrot.lane.b32.xlu1 %v374_v0, %s1836_s20 }
 0x4c4   :  { %v377_v2 = vpop.permute.xlu1 %376 }
 0x4c5   :  { %v379_v3 = vadd.f32 %v377_v2, %v369_v1 }
 0x4c7   :  { %1724 = vtanh.f32 %v379_v3 }
 0x4d1   :  { %v1725_v4 = vpop.eup %1724 }
 0x4d2   :  { %382 = vrot.lane.b32.xlu0 %v1725_v4, %s1835_s3 }
 0x544   :  { %v383_v5 = vpop.permute.xlu0 %382 }
 0x545   :  { %v2003_v9 = vmul.f32 %v1723_v60, %v383_v5 }
 0x547   :  { %387 = vrot.lane.b32.xlu1 %v2003_v9, %s1835_s3 }
 0x5b9   :  { %v388_v10 = vpop.permute.xlu1 %387 }
 0x5ba   :  { %1490 = vmatmul.mubr.msk.f32.vlgmr.msra.gmra.mrb[0].mxu0 %vm185_vm2, %v388_v10 }
 0x5bb   :  { %1577 = vmatpush3.bf16.msra.mxu0 %v1913_v7  ;;  %1511 = vmatprep.mubr.msk.f32.mxu0 %vm1833_vm1, %v1834_v8 }
 0x5bc   :  { %1578 = vmatprep.subr.bf16.mxu0 %v1832_v6 }
 0x5bf   :  { %1580 = vmatpush3.bf16.msra.mxu0 %v1933_v13 }
 0x5c0   :  { %1587 = vmatprep.subr.bf16.mxu0 %v1832_v6 }
 0x68d   :  { %v457_v11 = vpop.f32.mrb[0].mxu0 }
 0x68e   :  { %v461_v12 = vadd.f32 %v457_v11, %v1976_v26  ;;  %v1491_v14 = vpop.f32.mrb[1].mxu0 }
 0x690   :  { %v1340_v15 = vmul.f32 -1.442695, %v461_v12 }
 0x692   :  { %1726 = vpow2.f32 %v1340_v15 }
 0x69c   :  { %v1727_v16 = vpop.eup %1726 }
 0x69d   :  { %v465_v17 = vadd.f32 1.0, %v1727_v16 }
 0x69f   :  { %1728 = vrcp.f32 %v465_v17 }
 0x6a9   :  { %v1729_v18 = vpop.eup %1728 }
 0x6aa   :  { %v468_v19 = vmul.f32 2.0, %v1729_v18  ;;  %v470_v23 = vmul.f32 %v1729_v18, %v379_v3 }
 0x6ac   :  { %v1341_v20 = vadd.f32 -1.0, %v468_v19 }
 0x6ae   :  { %472 = vrot.lane.b32.xlu0 %v1341_v20, %s1835_s3 }
 0x720   :  { %v473_v21 = vpop.permute.xlu0 %472 }
 0x721   :  { %v475_v22 = vmul.f32 %v1729_v18, %v473_v21 }
 0x723   :  { %477 = vrot.lane.b32.xlu1 %v475_v22, %s1836_s20 }
 0x795   :  { %v478_v25 = vpop.permute.xlu1 %477 }
 0x796   :  { %v480_v27 = vadd.f32 %v478_v25, %v470_v23 }
 0x798   :  { %1730 = vtanh.f32 %v480_v27 }
 0x7a2   :  { %v1731_v26 = vpop.eup %1730 }
 0x7a3   :  { %483 = vrot.lane.b32.xlu0 %v1731_v26, %s1835_s3 }
 0x815   :  { %v484_v29 = vpop.permute.xlu0 %483 }
 0x816   :  { %v2018_v31 = vmul.f32 %v1729_v18, %v484_v29 }
 0x818   :  { %488 = vrot.lane.b32.xlu1 %v2018_v31, %s1835_s3 }
 0x88a   :  { %v489_v33 = vpop.permute.xlu1 %488 }
 0x88b   :  { %1501 = vmatmul.mubr.msk.f32.vlgmr.msra.gmra.mrb[12].mxu1 %vm185_vm2, %v489_v33 }
 0x88c   :  { %1583 = vmatpush3.bf16.msra.mxu1 %v1913_v7  ;;  %1522 = vmatprep.mubr.msk.f32.mxu1 %vm1833_vm1, %v1834_v8 }
 0x88d   :  { %1584 = vmatprep.subr.bf16.mxu1 %v1832_v6 }
 0x890   :  { %1586 = vmatpush3.bf16.msra.mxu1 %v1933_v13 }
 0x891   :  { %1593 = vmatprep.subr.bf16.mxu1 %v1832_v6 }
 0x95e   :  { %v558_v35 = vpop.f32.mrb[12].mxu1 }
 0x95f   :  { %v562_v36 = vadd.f32 %v558_v35, %v1974_v24  ;;  %v1502_v37 = vpop.f32.mrb[13].mxu1 }
 0x961   :  { %v1343_v38 = vmul.f32 -1.442695, %v562_v36 }
 0x963   :  { %1732 = vpow2.f32 %v1343_v38 }
 0x96d   :  { %v1733_v39 = vpop.eup %1732 }
 0x96e   :  { %v566_v40 = vadd.f32 1.0, %v1733_v39 }
 0x970   :  { %1734 = vrcp.f32 %v566_v40 }
 0x97a   :  { %v1735_v41 = vpop.eup %1734 }
 0x97b   :  { %v569_v42 = vmul.f32 2.0, %v1735_v41  ;;  %v571_v46 = vmul.f32 %v1735_v41, %v480_v27 }
 0x97d   :  { %v1344_v43 = vadd.f32 -1.0, %v569_v42 }
 0x97f   :  { %573 = vrot.lane.b32.xlu0 %v1344_v43, %s1835_s3 }
 0x9f1   :  { %v574_v44 = vpop.permute.xlu0 %573 }
 0x9f2   :  { %v576_v45 = vmul.f32 %v1735_v41, %v574_v44 }
 0x9f4   :  { %578 = vrot.lane.b32.xlu1 %v576_v45, %s1836_s20 }
 0xa66   :  { %v579_v47 = vpop.permute.xlu1 %578 }
 0xa67   :  { %v581_v48 = vadd.f32 %v579_v47, %v571_v46 }
 0xa69   :  { %1736 = vtanh.f32 %v581_v48 }
 0xa73   :  { %v1737_v24 = vpop.eup %1736 }
 0xa74   :  { %584 = vrot.lane.b32.xlu0 %v1737_v24, %s1835_s3 }
 0xae6   :  { %v585_v49 = vpop.permute.xlu0 %584 }
 0xae7   :  { %v2033_v50 = vmul.f32 %v1735_v41, %v585_v49 }
 0xae9   :  { %589 = vrot.lane.b32.xlu1 %v2033_v50, %s1835_s3 }
 0xb5b   :  { %v590_v51 = vpop.permute.xlu1 %589 }
 0xb5c   :  { %1512 = vmatmul.mubr.msk.f32.vlgmr.msra.gmra.mrb[2].mxu0 %vm185_vm2, %v590_v51 }
 0xb5d   :  { %1589 = vmatpush3.bf16.msra.mxu0 %v1913_v7  ;;  %1533 = vmatprep.mubr.msk.f32.mxu0 %vm1833_vm1, %v1834_v8 }
 0xb5e   :  { %1590 = vmatprep.subr.bf16.mxu0 %v1832_v6 }
 0xb61   :  { %1592 = vmatpush3.bf16.msra.mxu0 %v1933_v13 }
 0xc2f   :  { %v659_v52 = vpop.f32.mrb[2].mxu0 }
 0xc30   :  { %v663_v54 = vadd.f32 %v659_v52, %v1980_v30  ;;  %v1513_v55 = vpop.f32.mrb[3].mxu0 }
 0xc32   :  { %v1346_v56 = vmul.f32 -1.442695, %v663_v54 }
 0xc34   :  { %1738 = vpow2.f32 %v1346_v56 }
 0xc3e   :  { %v1739_v57 = vpop.eup %1738 }
 0xc3f   :  { %v667_v58 = vadd.f32 1.0, %v1739_v57 }
 0xc41   :  { %1740 = vrcp.f32 %v667_v58 }
 0xc4b   :  { %v1741_v59 = vpop.eup %1740 }
 0xc4c   :  { %v670_v60 = vmul.f32 2.0, %v1741_v59  ;;  %v672_v0 = vmul.f32 %v1741_v59, %v581_v48 }
 0xc4e   :  { %v1347_v61 = vadd.f32 -1.0, %v670_v60 }
 0xc50   :  { %674 = vrot.lane.b32.xlu0 %v1347_v61, %s1835_s3 }
 0xcc2   :  { %v675_v62 = vpop.permute.xlu0 %674 }
 0xcc3   :  { %v677_v63 = vmul.f32 %v1741_v59, %v675_v62  ;;  %v1021_v62 = vld [vmem:[%s2428_s4 + $0x8] sm:$0xff] }
 0xcc5   :  { %679 = vrot.lane.b32.xlu1 %v677_v63, %s1836_s20  ;;  %v1023_v63 = vld [vmem:[%s2428_s4 + $0x18] sm:$0xff] }
 0xd37   :  { %v680_v1 = vpop.permute.xlu1 %679 }
 0xd38   :  { %v682_v2 = vadd.f32 %v680_v1, %v672_v0  ;;  %v1599_v0 = vpack.c.bf16 %v1023_v63, %v1021_v62  ;;  %v1022_v1 = vld [vmem:[%s2428_s4 + $0x10] sm:$0xff]  ;;  %v1056_v62 = vld [vmem:[%s2428_s4 + $0x120] sm:$0xff] }
 0xd39   :  { %v1058_v63 = vld [vmem:[%s2428_s4 + $0x130] sm:$0xff] }
 0xd3a   :  { %1742 = vtanh.f32 %v682_v2  ;;  %1600 = vmatprep.subr.bf16.mxu0 %v1599_v0  ;;  %v1063_v0 = vld [vmem:[%s2428_s4 + $0x158] sm:$0xff] }
 0xd44   :  { %v1743_v30 = vpop.eup %1742 }
 0xd45   :  { %685 = vrot.lane.b32.xlu0 %v1743_v30, %s1835_s3  ;;  %v1027_v30 = vld [vmem:[%s2428_s4 + $0x38] sm:$0xff] }
 0xdb7   :  { %v686_v3 = vpop.permute.xlu0 %685 }
 0xdb8   :  { %v688_v4 = vmul.f32 %v1741_v59, %v686_v3 }
 0xdba   :  { %690 = vrot.lane.b32.xlu1 %v688_v4, %s1835_s3 }
 0xe2c   :  { %v2048_v5 = vpop.permute.xlu1 %690 }
 0xe2d   :  { %1523 = vmatmul.mubr.msk.f32.vlgmr.msra.gmra.mrb[14].mxu1 %vm185_vm2, %v2048_v5 }
 0xe2e   :  { %1595 = vmatpush3.bf16.msra.mxu1 %v1913_v7  ;;  %1544 = vmatprep.mubr.msk.f32.mxu1 %vm1833_vm1, %v1834_v8 }
 0xe2f   :  { %1596 = vmatprep.subr.bf16.mxu1 %v1832_v6 }
 0xe32   :  { %1598 = vmatpush3.bf16.msra.mxu1 %v1933_v13 }
 0xf00   :  { %v760_v10 = vpop.f32.mrb[14].mxu1 }
 0xf01   :  { %v764_v11 = vadd.f32 %v760_v10, %v1978_v28  ;;  %v1524_v12 = vpop.f32.mrb[15].mxu1  ;;  %v1024_v10 = vld [vmem:[%s2428_s4 + $0x20] sm:$0xff] }
 0xf02   :  { %v1029_v12 = vld [vmem:[%s2428_s4 + $0x48] sm:$0xff] }
 0xf03   :  { %v1349_v14 = vmul.f32 -1.442695, %v764_v11  ;;  %v1026_v11 = vld [vmem:[%s2428_s4 + $0x30] sm:$0xff] }
 0xf05   :  { %1744 = vpow2.f32 %v1349_v14  ;;  %v1031_v14 = vld [vmem:[%s2428_s4 + $0x58] sm:$0xff] }
 0xf0f   :  { %v1745_v15 = vpop.eup %1744 }
 0xf10   :  { %v768_v16 = vadd.f32 1.0, %v1745_v15  ;;  %v1605_v15 = vpack.c.bf16 %v1026_v11, %v1024_v10  ;;  %v1067_v10 = vld [vmem:[%s2428_s4 + $0x178] sm:$0xff] }
 0xf12   :  { %1746 = vrcp.f32 %v768_v16  ;;  %v1607_v16 = vpack.c.bf16 %v1031_v14, %v1029_v12  ;;  %v1064_v14 = vld [vmem:[%s2428_s4 + $0x160] sm:$0xff] }
 0xf1c   :  { %v1747_v17 = vpop.eup %1746 }
 0xf1d   :  { %v771_v18 = vmul.f32 2.0, %v1747_v17  ;;  %v773_v6 = vmul.f32 %v1747_v17, %v682_v2  ;;  %v1025_v2 = vld [vmem:[%s2428_s4 + $0x28] sm:$0xff] }
 0xf1e   :  { %v1603_v4 = vpack.c.bf16 %v1027_v30, %v1025_v2  ;;  %v1060_v30 = vld [vmem:[%s2428_s4 + $0x140] sm:$0xff] }
 0xf1f   :  { %v1350_v19 = vadd.f32 -1.0, %v771_v18  ;;  %v1030_v18 = vld [vmem:[%s2428_s4 + $0x50] sm:$0xff] }
 0xf21   :  { %775 = vrot.lane.b32.xlu0 %v1350_v19, %s1835_s3  ;;  %v1033_v19 = vld [vmem:[%s2428_s4 + $0x68] sm:$0xff] }
 0xf93   :  { %v776_v7 = vpop.permute.xlu0 %775 }
 0xf94   :  { %v778_v8 = vmul.f32 %v1747_v17, %v776_v7  ;;  %v1035_v7 = vld [vmem:[%s2428_s4 + $0x78] sm:$0xff] }
 0xf96   :  { %780 = vrot.lane.b32.xlu1 %v778_v8, %s1836_s20 }
0x1008   :  { %v781_v13 = vpop.permute.xlu1 %780 }
0x1009   :  { %v783_v20 = vadd.f32 %v781_v13, %v773_v6  ;;  %v1611_v13 = vpack.c.bf16 %v1035_v7, %v1033_v19  ;;  %v1068_v7 = vld [vmem:[%s2428_s4 + $0x180] sm:$0xff] }
0x100b   :  { %1748 = vtanh.f32 %v783_v20 }
0x1015   :  { %v1749_v28 = vpop.eup %1748 }
0x1016   :  { %786 = vrot.lane.b32.xlu0 %v1749_v28, %s1835_s3  ;;  %v1034_v28 = vld [vmem:[%s2428_s4 + $0x70] sm:$0xff] }
0x1088   :  { %v787_v21 = vpop.permute.xlu0 %786 }
0x1089   :  { %v789_v22 = vmul.f32 %v1747_v17, %v787_v21  ;;  %v1028_v17 = vld [vmem:[%s2428_s4 + $0x40] sm:$0xff]  ;;  %v1037_v21 = vld [vmem:[%s2428_s4 + $0x88] sm:$0xff] }
0x108a   :  { %v1609_v6 = vpack.c.bf16 %v1030_v18, %v1028_v17  ;;  %v1071_v17 = vld [vmem:[%s2428_s4 + $0x198] sm:$0xff] }
0x108b   :  { %791 = vrot.lane.b32.xlu1 %v789_v22, %s1835_s3 }
0x10fd   :  { %v792_v23 = vpop.permute.xlu1 %791 }
0x10fe   :  { %1534 = vmatmul.mubr.msk.f32.vlgmr.msra.gmra.mrb[4].mxu0 %vm185_vm2, %v792_v23 }
0x11d1   :  { %v861_v25 = vpop.f32.mrb[4].mxu0 }
0x11d2   :  { %v865_v27 = vadd.f32 %v861_v25, %v1984_v34  ;;  %v1535_v26 = vpop.f32.mrb[5].mxu0 }
0x11d3   :  { %v1038_v26 = vld [vmem:[%s2428_s4 + $0x90] sm:$0xff] }
0x11d4   :  { %v1352_v29 = vmul.f32 -1.442695, %v865_v27  ;;  %v1036_v27 = vld [vmem:[%s2428_s4 + $0x80] sm:$0xff] }
0x11d6   :  { %1750 = vpow2.f32 %v1352_v29  ;;  %v1041_v29 = vld [vmem:[%s2428_s4 + $0xa8] sm:$0xff] }
0x11e0   :  { %v1751_v33 = vpop.eup %1750 }
0x11e1   :  { %v869_v35 = vadd.f32 1.0, %v1751_v33  ;;  %v1043_v33 = vld [vmem:[%s2428_s4 + $0xb8] sm:$0xff] }
0x11e3   :  { %1752 = vrcp.f32 %v869_v35  ;;  %v1617_v35 = vpack.c.bf16 %v1038_v26, %v1036_v27 }
0x11ed   :  { %v1753_v36 = vpop.eup %1752 }
0x11ee   :  { %v872_v37 = vmul.f32 2.0, %v1753_v36  ;;  %v874_v41 = vmul.f32 %v1753_v36, %v783_v20  ;;  %v1032_v20 = vld [vmem:[%s2428_s4 + $0x60] sm:$0xff] }
0x11ef   :  { %v1613_v23 = vpack.c.bf16 %v1034_v28, %v1032_v20 }
0x11f0   :  { %v1353_v38 = vadd.f32 -1.0, %v872_v37  ;;  %v1040_v37 = vld [vmem:[%s2428_s4 + $0xa0] sm:$0xff] }
0x11f2   :  { %876 = vrot.lane.b32.xlu0 %v1353_v38, %s1835_s3  ;;  %v1042_v38 = vld [vmem:[%s2428_s4 + $0xb0] sm:$0xff] }
0x1264   :  { %v877_v39 = vpop.permute.xlu0 %876 }
0x1265   :  { %v879_v40 = vmul.f32 %v1753_v36, %v877_v39  ;;  %v1045_v39 = vld [vmem:[%s2428_s4 + $0xc8] sm:$0xff] }
0x1267   :  { %881 = vrot.lane.b32.xlu1 %v879_v40, %s1836_s20  ;;  %v1047_v40 = vld [vmem:[%s2428_s4 + $0xd8] sm:$0xff] }
0x12d9   :  { %v882_v42 = vpop.permute.xlu1 %881 }
0x12da   :  { %v884_v43 = vadd.f32 %v882_v42, %v874_v41  ;;  %v1621_v41 = vpack.c.bf16 %v1042_v38, %v1040_v37  ;;  %v1623_v42 = vpack.c.bf16 %v1047_v40, %v1045_v39  ;;  %v1083_v37 = vld [vmem:[%s2428_s4 + $0x1f8] sm:$0xff]  ;;  %v1080_v39 = vld [vmem:[%s2428_s4 + $0x1e0] sm:$0xff]  ;;  %v1082_v40 = vld [vmem:[%s2428_s4 + $0x1f0] sm:$0xff] }
0x12dc   :  { %1754 = vtanh.f32 %v884_v43 }
0x12e6   :  { %v1755_v34 = vpop.eup %1754 }
0x12e7   :  { %887 = vrot.lane.b32.xlu0 %v1755_v34, %s1835_s3  ;;  %v1046_v34 = vld [vmem:[%s2428_s4 + $0xd0] sm:$0xff] }
0x1359   :  { %v888_v44 = vpop.permute.xlu0 %887 }
0x135a   :  { %v2067_v45 = vmul.f32 %v1753_v36, %v888_v44  ;;  %v1619_v36 = vpack.c.bf16 %v1043_v33, %v1041_v29  ;;  %v1049_v44 = vld [vmem:[%s2428_s4 + $0xe8] sm:$0xff]  ;;  %v1076_v29 = vld [vmem:[%s2428_s4 + $0x1c0] sm:$0xff]  ;;  %v1078_v33 = vld [vmem:[%s2428_s4 + $0x1d0] sm:$0xff] }
0x135c   :  { %892 = vrot.lane.b32.xlu1 %v2067_v45, %s1835_s3 }
0x13ce   :  { %v893_v46 = vpop.permute.xlu1 %892 }
0x13cf   :  { %1545 = vmatmul.mubr.msk.f32.vlgmr.msra.gmra.mrb[16].mxu1 %vm185_vm2, %v893_v46  ;;  %v1051_v46 = vld [vmem:[%s2428_s4 + $0xf8] sm:$0xff] }
0x14a2   :  { %v962_v47 = vpop.f32.mrb[16].mxu1 }
0x14a3   :  { %v966_v48 = vadd.f32 %v962_v47, %v1982_v32  ;;  %v1546_v24 = vpop.f32.mrb[17].mxu1  ;;  %v1704_v32 = vpack.i.bf16 %v2003_v9, %v789_v22  ;;  %v1020_v9 = vld [vmem:[%s2428_s4] sm:$0xff]  ;;  %v1039_v22 = vld [vmem:[%s2428_s4 + $0x98] sm:$0xff] }
0x14a4   :  { %v1601_v3 = vpack.c.bf16 %v1022_v1, %v1020_v9  ;;  %v1615_v25 = vpack.c.bf16 %v1039_v22, %v1037_v21  ;;  %v1048_v24 = vld [vmem:[%s2428_s4 + $0xe0] sm:$0xff]  ;;  %v1061_v9 = vld [vmem:[%s2428_s4 + $0x148] sm:$0xff]  ;;  %v1637_v1 = vpack.c.bf16 %v1058_v63, %v1056_v62  ;;  %v1074_v22 = vld [vmem:[%s2428_s4 + $0x1b0] sm:$0xff] }
0x14a5   :  { %v1355_v49 = vmul.f32 -1.442695, %v966_v48  ;;  %v1627_v48 = vpack.c.bf16 %v1051_v46, %v1049_v44  ;;  %v1639_v2 = vpack.c.bf16 %v1063_v0, %v1061_v9  ;;  %v1072_v21 = vld [vmem:[%s2428_s4 + $0x1a0] sm:$0xff]  ;;  %v1174_v46 = vld [vmem:[%s2430_s6 + $0x8] sm:$0xff]  ;;  %v1195_v62 = vld [vmem:[%s2430_s6 + $0xb0] sm:$0xff] }
0x14a6   :  { %1602 = vmatpush1.bf16.msra.mxu0 %v1601_v3  ;;  %v1062_v3 = vld [vmem:[%s2428_s4 + $0x150] sm:$0xff]  ;;  %v1653_v27 = vpack.c.bf16 %v1074_v22, %v1072_v21  ;;  %v1196_v63 = vld [vmem:[%s2430_s6 + $0xb8] sm:$0xff] }
0x14a7   :  { %1756 = vpow2.f32 %v1355_v49  ;;  %1604 = vmatprep.subr.bf16.mxu0 %v1603_v4  ;;  %v1050_v49 = vld [vmem:[%s2428_s4 + $0xf0] sm:$0xff]  ;;  %v1065_v4 = vld [vmem:[%s2428_s4 + $0x168] sm:$0xff]  ;;  %v1641_v11 = vpack.c.bf16 %v1062_v3, %v1060_v30  ;;  %v1675_v0 = vpack.c.bf16 %v1196_v63, %v1195_v62 }
0x14a8   :  { %v1643_v12 = vpack.c.bf16 %v1067_v10, %v1065_v4  ;;  %v1198_v30 = vld [vmem:[%s2430_s6 + $0xc8] sm:$0xff]  ;;  %v1181_v10 = vld [vmem:[%s2430_s6 + $0x40] sm:$0xff] }
0x14aa   :  { %1606 = vmatpush1.bf16.msra.mxu0 %v1605_v15  ;;  %v1066_v15 = vld [vmem:[%s2428_s4 + $0x170] sm:$0xff] }
0x14ab   :  { %1608 = vmatprep.subr.bf16.mxu0 %v1607_v16  ;;  %v1069_v16 = vld [vmem:[%s2428_s4 + $0x188] sm:$0xff]  ;;  %v1645_v18 = vpack.c.bf16 %v1066_v15, %v1064_v14  ;;  %v1200_v14 = vld [vmem:[%s2430_s6 + $0xd8] sm:$0xff] }
0x14ac   :  { %v1647_v19 = vpack.c.bf16 %v1071_v17, %v1069_v16  ;;  %v1183_v17 = vld [vmem:[%s2430_s6 + $0x50] sm:$0xff] }
0x14ae   :  { %1610 = vmatpush1.bf16.msra.mxu0 %v1609_v6  ;;  %v1073_v6 = vld [vmem:[%s2428_s4 + $0x1a8] sm:$0xff] }
0x14af   :  { %1612 = vmatprep.subr.bf16.mxu0 %v1611_v13  ;;  %v1075_v13 = vld [vmem:[%s2428_s4 + $0x1b8] sm:$0xff] }
0x14b0   :  { %v1651_v28 = vpack.c.bf16 %v1075_v13, %v1073_v6 }
0x14b1   :  { %v1757_v51 = vpop.eup %1756 }
0x14b2   :  { %v970_v52 = vadd.f32 1.0, %v1757_v51  ;;  %1614 = vmatpush1.bf16.msra.mxu0 %v1613_v23  ;;  %v1053_v51 = vld [vmem:[%s2428_s4 + $0x108] sm:$0xff] }
0x14b3   :  { %1616 = vmatprep.subr.bf16.mxu0 %v1615_v25  ;;  %v1077_v23 = vld [vmem:[%s2428_s4 + $0x1c8] sm:$0xff]  ;;  %v1079_v25 = vld [vmem:[%s2428_s4 + $0x1d8] sm:$0xff] }
0x14b4   :  { %1758 = vrcp.f32 %v970_v52  ;;  %v1055_v52 = vld [vmem:[%s2428_s4 + $0x118] sm:$0xff]  ;;  %v1655_v26 = vpack.c.bf16 %v1079_v25, %v1077_v23 }
0x14b6   :  { %1618 = vmatpush1.bf16.msra.mxu0 %v1617_v35  ;;  %v1657_v35 = vpack.c.bf16 %v1078_v33, %v1076_v29 }
0x14b7   :  { %1620 = vmatprep.subr.bf16.mxu0 %v1619_v36  ;;  %v1081_v36 = vld [vmem:[%s2428_s4 + $0x1e8] sm:$0xff] }
0x14b8   :  { %v1659_v38 = vpack.c.bf16 %v1083_v37, %v1081_v36  ;;  %v1203_v36 = vld [vmem:[%s2430_s6 + $0xf0] sm:$0xff]  ;;  %v1204_v37 = vld [vmem:[%s2430_s6 + $0xf8] sm:$0xff] }
0x14ba   :  { %1622 = vmatpush1.bf16.msra.mxu0 %v1621_v41  ;;  %v1661_v41 = vpack.c.bf16 %v1082_v40, %v1080_v39  ;;  %v1187_v39 = vld [vmem:[%s2430_s6 + $0x70] sm:$0xff]  ;;  %v1188_v40 = vld [vmem:[%s2430_s6 + $0x78] sm:$0xff] }
0x14bb   :  { %1624 = vmatprep.subr.bf16.mxu0 %v1623_v42  ;;  %v1189_v42 = vld [vmem:[%s2430_s6 + $0x80] sm:$0xff] }
0x14be   :  { %v2073_v54 = vpop.eup %1758 }
0x14bf   :  { %v973_v55 = vmul.f32 2.0, %v2073_v54  ;;  %v975_v59 = vmul.f32 %v2073_v54, %v884_v43  ;;  %v1044_v43 = vld [vmem:[%s2428_s4 + $0xc0] sm:$0xff] }
0x14c0   :  { %v1625_v47 = vpack.c.bf16 %v1046_v34, %v1044_v43  ;;  %v1190_v43 = vld [vmem:[%s2430_s6 + $0x88] sm:$0xff]  ;;  %v1173_v34 = vld [vmem:[%s2430_s6] sm:$0xff] }
0x14c1   :  { %v1356_v56 = vadd.f32 -1.0, %v973_v55  ;;  %v1629_v55 = vpack.c.bf16 %v1050_v49, %v1048_v24  ;;  %v1663_v44 = vpack.c.bf16 %v1190_v43, %v1189_v42  ;;  %v1665_v24 = vpack.c.bf16 %v1174_v46, %v1173_v34 }
0x14c2   :  { %1626 = vmatpush1.bf16.msra.mxu0 %v1625_v47  ;;  %v1191_v47 = vld [vmem:[%s2430_s6 + $0x90] sm:$0xff]  ;;  %v1086_v42 = vlaneseq }
0x14c3   :  { %977 = vrot.lane.b32.xlu0 %v1356_v56, %s1835_s3  ;;  %1628 = vmatprep.subr.bf16.mxu0 %v1627_v48  ;;  %v1631_v56 = vpack.c.bf16 %v1055_v52, %v1053_v51  ;;  %v1192_v48 = vld [vmem:[%s2430_s6 + $0x98] sm:$0xff]  ;;  %v1175_v51 = vld [vmem:[%s2430_s6 + $0x10] sm:$0xff] }
0x14c4   :  { %v1667_v49 = vpack.c.bf16 %v1192_v48, %v1191_v47  ;;  %v1176_v52 = vld [vmem:[%s2430_s6 + $0x18] sm:$0xff]  ;;  %1664 = vmatprep.subr.bf16.mxu1 %v1663_v44  ;;  %v1087_v43 = vshrl.u32 %v1086_v42, 7  ;;  %v1084_v44 = vld [vmem:[%s2429_s5] sm:$0x3] }
0x14c5   :  { %1666 = vmatpush3.bf16.msra.mxu1 %v1665_v24 }
0x14c6   :  { %1630 = vmatpush1.bf16.msra.mxu0 %v1629_v55  ;;  %v1193_v55 = vld [vmem:[%s2430_s6 + $0xa0] sm:$0xff]  ;;  %1668 = vmatprep.subr.bf16.mxu1 %v1667_v49  ;;  %v1088_v34 = vsub.s32 0, %v1087_v43  ;;  %v1092_v46 = vsub.s32 1, %v1087_v43 }
0x14c7   :  { %1632 = vmatprep.subr.bf16.mxu0 %v1631_v56  ;;  %v1194_v56 = vld [vmem:[%s2430_s6 + $0xa8] sm:$0xff] }
0x14c8   :  { %v1089_v47 = vrot.slane %v1084_v44, %v1088_v34  ;;  %v1093_v48 = vrot.slane %v1084_v44, %v1092_v46 }
0x1535   :  { %v978_v57 = vpop.permute.xlu0 %977 }
0x1536   :  { %v980_v58 = vmul.f32 %v2073_v54, %v978_v57  ;;  %v1052_v57 = vld [vmem:[%s2428_s4 + $0x100] sm:$0xff] }
0x1538   :  { %982 = vrot.lane.b32.xlu1 %v980_v58, %s1836_s20  ;;  %v1054_v58 = vld [vmem:[%s2428_s4 + $0x110] sm:$0xff] }
0x153c   :  { %1705 = vrot.lane.b32.xlu1 %v1704_v32, %s1836_s20  ;;  %v1057_v32 = vld [vmem:[%s2428_s4 + $0x128] sm:$0xff] }
0x15aa   :  { %v983_v60 = vpop.permute.xlu1 %982 }
0x15ab   :  { %v985_v61 = vadd.f32 %v983_v60, %v975_v59  ;;  %v1059_v59 = vld [vmem:[%s2428_s4 + $0x138] sm:$0xff]  ;;  %v1633_v60 = vpack.c.bf16 %v1054_v58, %v1052_v57  ;;  %v1669_v58 = vpack.c.bf16 %v1176_v52, %v1175_v51 }
0x15ad   :  { %1760 = vtanh.f32 %v985_v61  ;;  %997 = vst.msk [vmem:[#allocation6] sm:$0xff] %vm185_vm2, %v985_v61  ;;  %v1635_v61 = vpack.c.bf16 %v1059_v59, %v1057_v32  ;;  %1634 = vmatpush1.bf16.msra.mxu0 %v1633_v60  ;;  %v1671_v59 = vpack.c.bf16 %v1194_v56, %v1193_v55  ;;  %v1177_v60 = vld [vmem:[%s2430_s6 + $0x20] sm:$0xff]  ;;  %1670 = vmatpush3.bf16.msra.mxu1 %v1669_v58 }
0x15af   :  { %1636 = vmatprep.subr.bf16.mxu0 %v1635_v61  ;;  %v1178_v61 = vld [vmem:[%s2430_s6 + $0x28] sm:$0xff]  ;;  %1672 = vmatprep.subr.bf16.mxu1 %v1671_v59 }
0x15b0   :  { %v1673_v9 = vpack.c.bf16 %v1178_v61, %v1177_v60 }
0x15b1   :  { %1638 = vmatpush1.bf16.msra.mxu0 %v1637_v1  ;;  %v1179_v1 = vld [vmem:[%s2430_s6 + $0x30] sm:$0xff] }
0x15b2   :  { %1640 = vmatprep.subr.bf16.mxu0 %v1639_v2  ;;  %v1180_v2 = vld [vmem:[%s2430_s6 + $0x38] sm:$0xff]  ;;  %1674 = vmatpush3.bf16.msra.mxu1 %v1673_v9 }
0x15b3   :  { %v1677_v3 = vpack.c.bf16 %v1180_v2, %v1179_v1  ;;  %1676 = vmatprep.subr.bf16.mxu1 %v1675_v0 }
0x15b5   :  { %1642 = vmatpush1.bf16.msra.mxu0 %v1641_v11  ;;  %v1182_v11 = vld [vmem:[%s2430_s6 + $0x48] sm:$0xff] }
0x15b6   :  { %1644 = vmatprep.subr.bf16.mxu0 %v1643_v12  ;;  %v1199_v12 = vld [vmem:[%s2430_s6 + $0xd0] sm:$0xff]  ;;  %1678 = vmatpush3.bf16.msra.mxu1 %v1677_v3  ;;  %v1681_v15 = vpack.c.bf16 %v1182_v11, %v1181_v10 }
0x15b7   :  { %v1761_v8 = vpop.eup %1760  ;;  %v1683_v16 = vpack.c.bf16 %v1200_v14, %v1199_v12 }
0x15b8   :  { %988 = vrot.lane.b32.xlu0 %v1761_v8, %s1835_s3  ;;  %v1070_v8 = vld [vmem:[%s2428_s4 + $0x190] sm:$0xff] }
0x15b9   :  { %1646 = vmatpush1.bf16.msra.mxu0 %v1645_v18  ;;  %v1649_v20 = vpack.c.bf16 %v1070_v8, %v1068_v7  ;;  %v1184_v18 = vld [vmem:[%s2430_s6 + $0x58] sm:$0xff]  ;;  %v1706_v7 = vpop.permute.xlu1 %1705 }
0x15ba   :  { %1648 = vmatprep.subr.bf16.mxu0 %v1647_v19  ;;  %v1685_v19 = vpack.c.bf16 %v1184_v18, %v1183_v17  ;;  %v1708_v8 = vunpack.i.h.bf16 %v1706_v7  ;;  %v1707_v6 = vunpack.i.l.bf16 %v1706_v7 }
0x15bd   :  { %1650 = vmatpush1.bf16.msra.mxu0 %v1649_v20  ;;  %v1012_v20 = vsel %vm185_vm2, %v1990_v53, %v1708_v8  ;;  %v1201_v53 = vld [vmem:[%s2430_s6 + $0xe0] sm:$0xff] }
0x15be   :  { %1652 = vmatprep.subr.bf16.mxu0 %v1651_v28  ;;  %v1017_v28 = vsel %vm185_vm2, %v2048_v5, %v1707_v6  ;;  %v1202_v5 = vld [vmem:[%s2430_s6 + $0xe8] sm:$0xff] }
0x15bf   :  { %v1018_v25 = vsel %vm1013_vm3, %v1017_v28, %v2067_v45  ;;  %v1687_v33 = vpack.c.bf16 %v1202_v5, %v1201_v53 }
0x15c1   :  { %1654 = vmatpush1.bf16.msra.mxu0 %v1653_v27  ;;  %v1014_v27 = vsel %vm1013_vm3, %v1012_v20, %v2018_v31  ;;  %v1186_v31 = vld [vmem:[%s2430_s6 + $0x68] sm:$0xff] }
0x15c2   :  { %1656 = vmatprep.subr.bf16.mxu0 %v1655_v26 }
0x15c5   :  { %1658 = vmatpush1.bf16.msra.mxu0 %v1657_v35  ;;  %v1185_v35 = vld [vmem:[%s2430_s6 + $0x60] sm:$0xff] }
0x15c6   :  { %1660 = vmatprep.subr.bf16.mxu0 %v1659_v38  ;;  %v1689_v45 = vpack.c.bf16 %v1186_v31, %v1185_v35  ;;  %v1691_v38 = vpack.c.bf16 %v1204_v37, %v1203_v36 }
0x15c9   :  { %1662 = vmatpush1.bf16.msra.mxu0 %v1661_v41  ;;  %v1693_v41 = vpack.c.bf16 %v1188_v40, %v1187_v39 }
0x162a   :  { %v989_v57 = vpop.permute.xlu0 %988 }
0x162b   :  { %v991_v32 = vmul.f32 %v2073_v54, %v989_v57 }
0x162d   :  { %v1709_v54 = vpack.i.bf16 %v2033_v50, %v991_v32  ;;  %993 = vrot.lane.b32.xlu1 %v991_v32, %s1835_s3  ;;  %v1197_v50 = vld [vmem:[%s2430_s6 + $0xc0] sm:$0xff]  ;;  %s1838_s6 = smov [#allocation4]  }
0x162e   :  { %v1679_v4 = vpack.c.bf16 %v1198_v30, %v1197_v50  ;;  %s1300_s26 = sshll.u32 %s1838_s6, 4  ;;  %s1301_s26 = int_to_ptr.vmem [resolvable:$true] %s1300_s26 }
0x162f   :  { %1710 = vrot.lane.b32.xlu0 %v1709_v54, %s1837_s16  ;;  %s1762_s27 = scalar_lea.vmem %s1301_s26, 128  ;;  %p1767_p1 = scmp.lt.s32.totalorder %s1301_s26, %s1301_s26 }
0x1630   :  { %1680 = vmatprep.subr.bf16.mxu1 %v1679_v4  ;;  %p1763_p0 = scmp.ne.s32.totalorder %s1301_s26, %s1762_s27  ;;  %p1768_p2 = scmp.lt.s32.totalorder %s1762_s27, %s1762_s27 }
0x1631   :  { %1682 = vmatpush3.bf16.msra.mxu1 %v1681_v15 }
0x1632   :  { %1684 = vmatprep.subr.bf16.mxu1 %v1683_v16  ;;  %p1769_p3 = por %p1768_p2, %p1767_p1 }
0x1634   :  { %p1770_p4 = pnand %p1769_p3, %p1763_p0 }
0x1635   :  { %1686 = vmatpush3.bf16.msra.mxu1 %v1685_v19 }
0x1636   :  { %1688 = vmatprep.subr.bf16.mxu1 %v1687_v33 }
0x1639   :  { %1690 = vmatpush3.bf16.msra.mxu1 %v1689_v45 }
0x163a   :  { %1692 = vmatprep.subr.bf16.mxu1 %v1691_v38 }
0x163d   :  { %1694 = vmatpush3.bf16.msra.mxu1 %v1693_v41 }
0x169f   :  { %v994_v13 = vpop.permute.xlu1 %993 }
0x16a0   :  { %996 = vst.msk [vmem:[#allocation4] sm:$0xff] %vm185_vm2, %v994_v13 }
0x16a1   :  { %v1711_v21 = vpop.permute.xlu0 %1710 }
0x16a2   :  { %v1713_v22 = vunpack.i.h.bf16 %v1711_v21  ;;  %v1712_v23 = vunpack.i.l.bf16 %v1711_v21 }
0x16a4   :  { %v1019_v26 = vsel %vm1015_vm4, %v1018_v25, %v1712_v23  ;;  %v1016_v29 = vsel %vm1015_vm4, %v1014_v27, %v1713_v22 }
0x16a5   :  { %1160 = vmatprep.mubr.f32.mxu0 %v1019_v26 }
0x16a6   :  { %1161 = vmatmul.mubr.f32.vlgmr.msra.gmra.mrb[6].mxu0 %v1016_v29 }
0x1779   :  { %v1162_v24 = vpop.f32.mrb[6].mxu0 }
0x177a   :  { %v1163_v49 = vadd.f32 %v1162_v24, %v1089_v47  ;;  %v1164_v51 = vpop.f32.mrb[7].mxu0 }
0x177b   :  { %v1165_v52 = vadd.f32 %v1164_v51, %v1093_v48 }
0x177c   :  { %v1169_v55 = vmul.f32 0.02, %v1163_v49  ;;  %vm1167_vm5 = vcmp.gt.f32.partialorder %v1163_v49, 0.0 }
0x177d   :  { %v1170_v56 = vmul.f32 0.02, %v1165_v52  ;;  %vm1168_vm6 = vcmp.gt.f32.partialorder %v1165_v52, 0.0 }
0x177e   :  { %v1171_v58 = vsel %vm1167_vm5, %v1163_v49, %v1169_v55 }
0x177f   :  { %v1172_v57 = vsel %vm1168_vm6, %v1165_v52, %v1170_v56 }
0x1780   :  { %1276 = vmatprep.mubr.f32.mxu1 %v1172_v57 }
0x1781   :  { %1277 = vmatmul.mubr.f32.vlgmr.msra.gmra.mrb[18].mxu1 %v1171_v58 }
0x1782   :  { %1773 = shalt.err (!%p1770_p4)
}
0x1783   :  { %s1774_s29 = scalar_lea.hbm %s2433_s9, 128 }
0x1784   :  { %p1775_p5 = scmp.ne.s32.totalorder %s2433_s9, %s1774_s29  ;;  %p1778_p6 = scmp.lt.u32.totalorder %s1774_s29, %s2433_s9 }
0x1786   :  { %p1780_p7 = pnand %p1778_p6, %p1775_p5 }
0x1788   :  { %1783 = shalt.err (!%p1780_p7)
}
0x1789   :  { %1303 = dma.vmem_to_hbm [thread:$0]  %s1301_s26, 128, %s2433_s9, [#allocation5]  }
0x178a   :  { %s1839_s15 = smov [#allocation6]  }
0x178b   :  { %s1310_s16 = sshll.u32 %s1839_s15, 4  ;;  %s1311_s16 = int_to_ptr.vmem [resolvable:$true] %s1310_s16 }
0x178c   :  { %s1784_s17 = scalar_lea.vmem %s1311_s16, 128  ;;  %p1789_p9 = scmp.lt.s32.totalorder %s1311_s16, %s1311_s16 }
0x178d   :  { %p1785_p8 = scmp.ne.s32.totalorder %s1311_s16, %s1784_s17  ;;  %p1790_p10 = scmp.lt.s32.totalorder %s1784_s17, %s1784_s17 }
0x178f   :  { %p1791_p11 = por %p1790_p10, %p1789_p9 }
0x1791   :  { %p1792_p12 = pnand %p1791_p11, %p1785_p8 }
0x1793   :  { %1795 = shalt.err (!%p1792_p12)
}
0x1794   :  { %s1796_s4 = scalar_lea.hbm %s2434_s10, 128 }
0x1795   :  { %p1797_p13 = scmp.ne.s32.totalorder %s2434_s10, %s1796_s4  ;;  %p1800_p0 = scmp.lt.u32.totalorder %s1796_s4, %s2434_s10 }
0x1797   :  { %p1802_p1 = pnand %p1800_p0, %p1797_p13 }
0x1799   :  { %1805 = shalt.err (!%p1802_p1)
}
0x179a   :  { %1313 = dma.vmem_to_hbm [thread:$0]  %s1311_s16, 128, %s2434_s10, [#allocation5]   ;;  %v1357_v60 = vld [vmem:[%s2431_s7] ss:$0 sm:$0xff]  ;;  %vm1282_vm7 = vcmask 64512  }
0x179b   :  { %s1840_s24 = smov [#allocation2]  }
0x179c   :  { %s1290_s25 = sshll.u32 %s1840_s24, 4  ;;  %s1291_s25 = int_to_ptr.vmem [resolvable:$true] %s1290_s25 }
0x179d   :  { %s1806_s6 = scalar_lea.vmem %s1291_s25, 128  ;;  %p1811_p3 = scmp.lt.s32.totalorder %s1291_s25, %s1291_s25 }
0x179e   :  { %p1807_p2 = scmp.ne.s32.totalorder %s1291_s25, %s1806_s6  ;;  %p1812_p4 = scmp.lt.s32.totalorder %s1806_s6, %s1806_s6 }
0x17a0   :  { %p1813_p5 = por %p1812_p4, %p1811_p3 }
0x17a2   :  { %p1814_p6 = pnand %p1813_p5, %p1807_p2 }
0x1854   :  { %v1440_v32 = vpop.f32.mrb[18].mxu1 }
0x1855   :  { %v1441_v59 = vpop.f32.mrb[19].mxu1 }
0x1856   :  { %v1442_v61 = vadd.f32 %v1441_v59, %v1440_v32 }
0x1858   :  { %v1279_v62 = vadd.f32 %v1442_v61, %v1357_v60 }
0x185a   :  { %1283 = vst.msk [vmem:[#allocation2] sm:$0xff] %vm1282_vm7, %v1279_v62 }
0x185b   :  { %1817 = shalt.err (!%p1814_p6)
}
0x185c   :  { %s1818_s27 = scalar_lea.hbm %s2432_s8, 128 }
0x185d   :  { %p1819_p7 = scmp.ne.s32.totalorder %s2432_s8, %s1818_s27  ;;  %p1822_p8 = scmp.lt.u32.totalorder %s1818_s27, %s2432_s8 }
0x185f   :  { %p1824_p9 = pnand %p1822_p8, %p1819_p7 }
0x1861   :  { %1827 = shalt.err (!%p1824_p9)
}
0x1862   :  { %1293 = dma.vmem_to_hbm [thread:$0]  %s1291_s25, 128, %s2432_s8, [#allocation3]  }
0x1863   :  { %1828 = dma.done.wait [#allocation3], 128  }
0x1864   :  { %1829 = vsyncadd [#allocation3], 4294967168 }
0x1865   :  { %1830 = dma.done.wait [#allocation5], 256  }
0x1866   :  { %1831 = vsyncadd [#allocation5], 4294967040 }
0x1867   :  { %1323 = vsyncpa [#allocation3], 1 }
0x1868   :  { %1324 = vsyncpa [#allocation5], 1 }

</bundles_post_ra>
